<compile_context>
chip_gen: v6e
topology: v6e:2x2x1
jax: 0.10.0
libtpu: 0.0.40
codegen_flags: <defaults>
</compile_context>

<pallas_src>
import jax
import jax.numpy as jnp
from jax.experimental import pallas as pl
from jax.experimental.pallas import tpu as pltpu

LANE = 128  # padded feature width inside the kernel (hidden sizes <= 128)


def dqn_mlp_kernel(x_ref, w_ref, b_ref, o_ref, xpad_ref):
    """Fused 3-layer MLP: relu(relu(x@W1+b1)@W2+b2)@W3+b3.

    x_ref:    (bt, obs)    f32  raw observations (obs = 8)
    w_ref:    (384, 128)   f32  [W1; W2; W3], each zero-padded to (128, 128)
    b_ref:    (3, 128)     f32  [b1; b2; b3], zero-padded lanes
    o_ref:    (bt, A)      f32  real Q-values only (A = 4)
    xpad_ref: (bt, 128)    f32  VMEM scratch: lane-padded activations for the MXU
    """
    obs = x_ref.shape[1]
    # Zero the padded-activation scratch every step (only bt/8 stores -- trivial next to
    # the matmuls) so unused lanes never feed garbage/NaN * 0 into the MXU, then drop
    # the narrow observation block into lanes [0, obs).
    xpad_ref[...] = jnp.zeros_like(xpad_ref)
    xpad_ref[:, 0:obs] = x_ref[...]
    x = xpad_ref[...]                                                 # f32 [bt, 128]

    # Layer 1 (MXU f32 matmul, f32 bias/ReLU on the VPU)
    h1 = jnp.dot(x, w_ref[0:LANE, :], preferred_element_type=jnp.float32)
    h1 = jnp.maximum(h1 + b_ref[0:1, :], 0.0)
    # Layer 2
    h2 = jnp.dot(h1, w_ref[LANE:2 * LANE, :], preferred_element_type=jnp.float32)
    h2 = jnp.maximum(h2 + b_ref[1:2, :], 0.0)
    # Layer 3 (Q-head, no activation) -- store only the real action lanes.
    q = jnp.dot(h2, w_ref[2 * LANE:3 * LANE, :], preferred_element_type=jnp.float32)
    q = q + b_ref[2:3, :]
    o_ref[...] = q[:, 0:o_ref.shape[1]].astype(o_ref.dtype)


def _round_up(x, m):
    return ((x + m - 1) // m) * m


def _pad2d(x, rows, cols, dtype):
    out = jnp.zeros((rows, cols), dtype)
    return out.at[: x.shape[0], : x.shape[1]].set(x.astype(dtype))


def pack_params(params):
    """One-time packing (call at init, NOT per forward): (w1,b1,w2,b2,w3,b3) ->
    one (384,128) f32 weight slab and one (3,128) f32 bias slab."""
    w1, b1, w2, b2, w3, b3 = params
    w_packed = jnp.concatenate(
        [_pad2d(w, LANE, LANE, jnp.float32) for w in (w1, w2, w3)], axis=0)  # (384,128)
    b_packed = jnp.concatenate(
        [_pad2d(b, 1, LANE, jnp.float32) for b in (b1, b2, b3)], axis=0)      # (3,128)
    return w_packed, b_packed


def _choose_batch_tile(B, batch_tile):
    bt = min(batch_tile, _round_up(B, 8))
    # Ensure >= 2 grid steps when the batch allows it, so the "parallel" batch axis
    # shards across both TensorCores on v7x (no-op on v5e/v6e).
    if B > 8 and _round_up(B, bt) // bt < 2:
        bt = _round_up((B + 1) // 2, 8)
    return bt


def dqn_forward(state, w_packed, b_packed, action_size, *, batch_tile=1024):
    """Q(s, a) for all actions.  state: [B, obs_size] f32 -> [B, action_size] f32."""
    state = state.astype(jnp.float32)
    B, obs = state.shape
    bt = _choose_batch_tile(B, batch_tile)
    Bp = _round_up(B, bt)
    # Row-pad only (no lane padding in HBM); usually a no-op for large batches.
    x = state if Bp == B else jnp.pad(state, ((0, Bp - B), (0, 0)))

    out = pl.pallas_call(
        dqn_mlp_kernel,
        out_shape=jax.ShapeDtypeStruct((Bp, action_size), jnp.float32),
        grid_spec=pltpu.PrefetchScalarGridSpec(
            num_scalar_prefetch=0,
            grid=(Bp // bt,),
            in_specs=[
                # narrow observations: tiled along the batch grid axis
                pl.BlockSpec((bt, obs), lambda i: (i, 0)),
                # packed weights / biases: constant index_map -> VMEM-resident, 1 DMA each
                pl.BlockSpec((3 * LANE, LANE), lambda i: (0, 0)),
                pl.BlockSpec((3, LANE), lambda i: (0, 0)),
            ],
            # narrow output: only the real action columns go back to HBM
            out_specs=pl.BlockSpec((bt, action_size), lambda i: (i, 0)),
            scratch_shapes=[pltpu.VMEM((bt, LANE), jnp.float32)],
        ),
        compiler_params=pltpu.CompilerParams(
            dimension_semantics=("parallel",),
        ),
    )(x, w_packed, b_packed)

    return out[:B]


def init_params(key, obs_size, hidden_layer_sizes, action_space_size):
    """Deterministic init mirroring torch.nn.Linear's default U(-1/sqrt(fan_in), 1/sqrt(fan_in))."""
    sizes = [obs_size] + list(hidden_layer_sizes) + [action_space_size]
    params = []
    for i in range(len(sizes) - 1):
        fan_in, fan_out = sizes[i], sizes[i + 1]
        key, kw, kb = jax.random.split(key, 3)
        bound = 1.0 / jnp.sqrt(fan_in)
        w = jax.random.uniform(kw, (fan_in, fan_out), jnp.float32, -bound, bound)
        b = jax.random.uniform(kb, (1, fan_out), jnp.float32, -bound, bound)
        params.extend([w, b])
    return tuple(params)


def reference_forward(state, params):
    w1, b1, w2, b2, w3, b3 = params
    h1 = jnp.maximum(state @ w1 + b1, 0.0)
    h2 = jnp.maximum(h1 @ w2 + b2, 0.0)
    return h2 @ w3 + b3


if __name__ == "__main__":
    # TODO(synk): only forward() is implemented; replay buffer / loss / optimizer /
    # target-network sync / select_action masking are host-side training machinery,
    # not kernel work.
    B, OBS, H1, H2, ACT = 8, 8, 32, 32, 4

    key = jax.random.PRNGKey(0)
    key, k_state = jax.random.split(key)
    state = jax.random.normal(k_state, (B, OBS), dtype=jnp.float32)
    params = init_params(key, OBS, [H1, H2], ACT)

    # Parameter packing hoisted out of the forward path: done once, reused everywhere.
    w_packed, b_packed = pack_params(params)
    w_packed, b_packed = jax.block_until_ready((w_packed, b_packed))

    # Small-batch run (single grid step, row-padded to a sublane multiple).
    q_values = jax.block_until_ready(dqn_forward(state, w_packed, b_packed, ACT))
    assert q_values.shape == (B, ACT)
    q_ref = reference_forward(state, params)
    assert jnp.allclose(q_values, q_ref, atol=2e-2, rtol=2e-2)

    # Single-observation (acting path, like select_action).
    q1 = jax.block_until_ready(dqn_forward(state[:1], w_packed, b_packed, ACT))
    assert q1.shape == (1, ACT)
    assert jnp.allclose(q1, q_ref[:1], atol=2e-2, rtol=2e-2)

    # Mid-size batch that triggers the >=2-grid-step split (v7x megacore sharding).
    state_mid = jax.random.normal(jax.random.PRNGKey(7), (1024, OBS), dtype=jnp.float32)
    q_mid = jax.block_until_ready(dqn_forward(state_mid, w_packed, b_packed, ACT))
    assert q_mid.shape == (1024, ACT)
    assert jnp.allclose(q_mid, reference_forward(state_mid, params), atol=2e-2, rtol=2e-2)

    # Large batch exercising the tiled batch grid with VMEM-resident weights.
    key, k_big = jax.random.split(key)
    state_big = jax.random.normal(k_big, (4096, OBS), dtype=jnp.float32)
    q_big = jax.block_until_ready(
        dqn_forward(state_big, w_packed, b_packed, ACT, batch_tile=1024))
    assert q_big.shape == (4096, ACT)
    assert jnp.allclose(q_big, reference_forward(state_big, params), atol=2e-2, rtol=2e-2)

    print("KERNEL_OK")
</pallas_src>

<mosaic_0001>
module attributes {stable_mosaic.version = 11 : i64} {
  func.func @dqn_mlp_kernel(%arg0: i32, %arg1: memref<8x8xf32, #tpu.memory_space<vmem>>, %arg2: memref<384x128xf32, #tpu.memory_space<vmem>>, %arg3: memref<3x128xf32, #tpu.memory_space<vmem>>, %arg4: memref<8x4xf32, #tpu.memory_space<vmem>>, %arg5: memref<8x128xf32, #tpu.memory_space<vmem>>) attributes {dimension_semantics = [#tpu.dimension_semantics<parallel>], iteration_bounds = array<i64: 1>, scalar_prefetch = 0 : i64, scratch_operands = 1 : i64, tpu.core_type = #tpu.core_type<tc>, window_params = [{transform_indices = @transform_0, window_bounds = array<i64: 8, 8>}, {pipeline_mode = #tpu.pipeline_mode<synchronous>, transform_indices = @transform_1, window_bounds = array<i64: 384, 128>}, {pipeline_mode = #tpu.pipeline_mode<synchronous>, transform_indices = @transform_2, window_bounds = array<i64: 3, 128>}, {transform_indices = @transform_3, window_bounds = array<i64: 8, 4>}]} {
    %cst = arith.constant 0.000000e+00 : f32
    %0 = vector.broadcast %cst : f32 to vector<8x128xf32>
    %c0 = arith.constant 0 : index
    %c0_0 = arith.constant 0 : index
    %1 = vector.load %arg5[%c0, %c0_0] : memref<8x128xf32, #tpu.memory_space<vmem>>, vector<8x128xf32>
    tpu.vector_store %arg5[%c0, %c0_0], %0 {strides = array<i32>} : memref<8x128xf32, #tpu.memory_space<vmem>>, vector<8x128xf32>,
    %c0_1 = arith.constant 0 : index
    %c0_2 = arith.constant 0 : index
    %2 = vector.load %arg1[%c0_1, %c0_2] : memref<8x8xf32, #tpu.memory_space<vmem>>, vector<8x8xf32>
    %c0_3 = arith.constant 0 : index
    %c0_4 = arith.constant 0 : index
    %3 = vector.load %arg5[%c0_3, %c0_4] : memref<8x128xf32, #tpu.memory_space<vmem>>, vector<8x8xf32>
    tpu.vector_store %arg5[%c0_3, %c0_4], %2 {strides = array<i32>} : memref<8x128xf32, #tpu.memory_space<vmem>>, vector<8x8xf32>,
    %c0_5 = arith.constant 0 : index
    %c0_6 = arith.constant 0 : index
    %4 = vector.load %arg5[%c0_5, %c0_6] : memref<8x128xf32, #tpu.memory_space<vmem>>, vector<8x128xf32>
    %c0_7 = arith.constant 0 : index
    %c0_8 = arith.constant 0 : index
    %5 = vector.load %arg2[%c0_7, %c0_8] : memref<384x128xf32, #tpu.memory_space<vmem>>, vector<128x128xf32>
    %cst_9 = arith.constant dense<0.000000e+00> : vector<8x128xf32>
    %6 = tpu.matmul %4, %5, %cst_9 {dimension_numbers = #tpu.dot_dimension_numbers<[1], [0], [0], [1], [0, 0, 1, 1], [], []>} : vector<8x128xf32>, vector<128x128xf32>, vector<8x128xf32> -> vector<8x128xf32>
    %c0_10 = arith.constant 0 : index
    %c0_11 = arith.constant 0 : index
    %7 = vector.load %arg3[%c0_10, %c0_11] : memref<3x128xf32, #tpu.memory_space<vmem>>, vector<1x128xf32>
    %8 = vector.broadcast %7 : vector<1x128xf32> to vector<8x128xf32>
    %9 = arith.addf %6, %8 : vector<8x128xf32>
    %cst_12 = arith.constant 0.000000e+00 : f32
    %10 = vector.broadcast %cst_12 : f32 to vector<8x128xf32>
    %11 = arith.maximumf %9, %10 : vector<8x128xf32>
    %c128 = arith.constant 128 : index
    %c0_13 = arith.constant 0 : index
    %12 = vector.load %arg2[%c128, %c0_13] : memref<384x128xf32, #tpu.memory_space<vmem>>, vector<128x128xf32>
    %cst_14 = arith.constant dense<0.000000e+00> : vector<8x128xf32>
    %13 = tpu.matmul %11, %12, %cst_14 {dimension_numbers = #tpu.dot_dimension_numbers<[1], [0], [0], [1], [0, 0, 1, 1], [], []>} : vector<8x128xf32>, vector<128x128xf32>, vector<8x128xf32> -> vector<8x128xf32>
    %c1 = arith.constant 1 : index
    %c0_15 = arith.constant 0 : index
    %14 = vector.load %arg3[%c1, %c0_15] : memref<3x128xf32, #tpu.memory_space<vmem>>, vector<1x128xf32>
    %15 = vector.broadcast %14 : vector<1x128xf32> to vector<8x128xf32>
    %16 = arith.addf %13, %15 : vector<8x128xf32>
    %cst_16 = arith.constant 0.000000e+00 : f32
    %17 = vector.broadcast %cst_16 : f32 to vector<8x128xf32>
    %18 = arith.maximumf %16, %17 : vector<8x128xf32>
    %c256 = arith.constant 256 : index
    %c0_17 = arith.constant 0 : index
    %19 = vector.load %arg2[%c256, %c0_17] : memref<384x128xf32, #tpu.memory_space<vmem>>, vector<128x128xf32>
    %cst_18 = arith.constant dense<0.000000e+00> : vector<8x128xf32>
    %20 = tpu.matmul %18, %19, %cst_18 {dimension_numbers = #tpu.dot_dimension_numbers<[1], [0], [0], [1], [0, 0, 1, 1], [], []>} : vector<8x128xf32>, vector<128x128xf32>, vector<8x128xf32> -> vector<8x128xf32>
    %c2 = arith.constant 2 : index
    %c0_19 = arith.constant 0 : index
    %21 = vector.load %arg3[%c2, %c0_19] : memref<3x128xf32, #tpu.memory_space<vmem>>, vector<1x128xf32>
    %22 = vector.broadcast %21 : vector<1x128xf32> to vector<8x128xf32>
    %23 = arith.addf %20, %22 : vector<8x128xf32>
    %24 = vector.extract_strided_slice %23 {offsets = [0, 0], sizes = [8, 4], strides = [1, 1]} : vector<8x128xf32> to vector<8x4xf32>
    %c0_20 = arith.constant 0 : index
    %c0_21 = arith.constant 0 : index
    %25 = vector.load %arg4[%c0_20, %c0_21] : memref<8x4xf32, #tpu.memory_space<vmem>>, vector<8x4xf32>
    tpu.vector_store %arg4[%c0_20, %c0_21], %24 {strides = array<i32>} : memref<8x4xf32, #tpu.memory_space<vmem>>, vector<8x4xf32>,
    return
  }
  func.func @transform_0(%arg0: i32) -> (i32, i32) {
    %c0_i32 = arith.constant 0 : i32
    %c0_i32_0 = arith.constant 0 : i32
    return %arg0, %c0_i32 : i32, i32
  }
  func.func @transform_1(%arg0: i32) -> (i32, i32) {
    %c0_i32 = arith.constant 0 : i32
    %c0_i32_0 = arith.constant 0 : i32
    %c0_i32_1 = arith.constant 0 : i32
    return %c0_i32, %c0_i32_0 : i32, i32
  }
  func.func @transform_2(%arg0: i32) -> (i32, i32) {
    %c0_i32 = arith.constant 0 : i32
    %c0_i32_0 = arith.constant 0 : i32
    %c0_i32_1 = arith.constant 0 : i32
    return %c0_i32, %c0_i32_0 : i32, i32
  }
  func.func @transform_3(%arg0: i32) -> (i32, i32) {
    %c0_i32 = arith.constant 0 : i32
    %c0_i32_0 = arith.constant 0 : i32
    return %arg0, %c0_i32 : i32, i32
  }
}

</mosaic_0001>

<bundles_post_ra>
// kernel: tpu_custom_call.1
= control target key start
LH: loop header
LB: loop body
LE: loop exit
PB: predicated region body
PF: predicated region fallthrough
CT: control target
= control target key end

     0   :  { %8 = vsyncpa [#allocation4], 0  ;;  %s663_s0 = inlined_call_operand.hbm [shape: f32[8,8], index: 0, kind: input, shape index: {}]   ;;  %s664_s1 = inlined_call_operand.hbm [shape: f32[384,128], index: 1, kind: input, shape index: {}]   ;;  %s665_s2 = inlined_call_operand.hbm [shape: f32[3,128], index: 2, kind: input, shape index: {}]   ;;  %s666_s3 = inlined_call_operand.vmem [shape: f32[8,4], index: 3, kind: output, shape index: {}]  }
   0x1   :  { %9 = vsyncpa [#allocation6], 0  ;;  %s569_s12 = smov [#allocation5]  }
   0x2   :  { %s25_s13 = sshll.u32 %s569_s12, 4  ;;  %s26_s13 = int_to_ptr.vmem [resolvable:$true] %s25_s13 }
   0x3   :  { %s513_s14 = scalar_lea.vmem %s26_s13, 6144  ;;  %p518_p1 = scmp.lt.s32.totalorder %s26_s13, %s26_s13 }
   0x4   :  { %p514_p0 = scmp.ne.s32.totalorder %s26_s13, %s513_s14  ;;  %p519_p2 = scmp.lt.s32.totalorder %s513_s14, %s513_s14 }
   0x6   :  { %p520_p3 = por %p519_p2, %p518_p1 }
   0x8   :  { %p521_p4 = pnand %p520_p3, %p514_p0 }
   0xa   :  { %524 = shalt.err (!%p521_p4)
}
   0xb   :  { %s570_s15 = smov 128   ;;  %s571_s16 = smov 8  }
   0xc   :  { %31 = dma.hbm_to_vmem [thread:$0]  %s664_s1, 6144, %s26_s13, [#allocation6], %s570_s15, %s570_s15, %s571_s16  }
   0xd   :  { %s572_s19 = smov [#allocation3]   ;;  %s573_s21 = smov [#allocation7]  }
   0xe   :  { %s16_s20 = sshll.u32 %s572_s19, 4  ;;  %s38_s22 = sshll.u32 %s573_s21, 4  ;;  %s17_s20 = int_to_ptr.vmem [resolvable:$true] %s16_s20  ;;  %s39_s22 = int_to_ptr.vmem [resolvable:$true] %s38_s22 }
   0xf   :  { %s533_s23 = scalar_lea.vmem %s17_s20, 128  ;;  %p538_p6 = scmp.lt.s32.totalorder %s17_s20, %s17_s20 }
  0x10   :  { %p534_p5 = scmp.ne.s32.totalorder %s17_s20, %s533_s23  ;;  %p539_p7 = scmp.lt.s32.totalorder %s533_s23, %s533_s23 }
  0x12   :  { %p540_p8 = por %p539_p7, %p538_p6 }
  0x14   :  { %p541_p9 = pnand %p540_p8, %p534_p5 }
  0x16   :  { %544 = shalt.err (!%p541_p9)
}
  0x17   :  { %19 = dma.hbm_to_vmem [thread:$0]  %s663_s0, 128, %s17_s20, [#allocation4]  }
  0x18   :  { %s553_s26 = scalar_lea.vmem %s39_s22, 64  ;;  %p558_p11 = scmp.lt.s32.totalorder %s39_s22, %s39_s22 }
  0x19   :  { %p554_p10 = scmp.ne.s32.totalorder %s39_s22, %s553_s26  ;;  %p559_p12 = scmp.lt.s32.totalorder %s553_s26, %s553_s26 }
  0x1b   :  { %p560_p13 = por %p559_p12, %p558_p11 }
  0x1d   :  { %p561_p0 = pnand %p560_p13, %p554_p10 }
  0x1f   :  { %564 = shalt.err (!%p561_p0)
}
  0x20   :  { %41 = dma.hbm_to_vmem [thread:$0]  %s665_s2, 64, %s39_s22, [#allocation6]  }
  0x21   :  { %565 = dma.done.wait [#allocation4], 128  }
  0x22   :  { %566 = vsyncadd [#allocation4], 4294967168 }
  0x23   :  { %567 = dma.done.wait [#allocation6], 6208  }
  0x24   :  { %568 = vsyncadd [#allocation6], 4294961088  ;;  %v574_v0 = vmov 0.0   ;;  %vm575_vm0 = vmmov 0   ;;  %v71_v1 = vld [vmem:[#allocation5 + $0x78] sm:$0xff]  ;;  %v70_v2 = vld [vmem:[#allocation5 + $0x70] sm:$0xff] }
  0x25   :  { %393 = vmatprep.subr.mxu0 %v574_v0  ;;  %51 = vst [vmem:[#allocation2] sm:$0xff] %v574_v0  ;;  %425 = vmatprep.mubr.msk.f32.mxu0 %vm575_vm0, %v574_v0  ;;  %v69_v3 = vld [vmem:[#allocation5 + $0x68] sm:$0xff]  ;;  %vm53_vm1 = vcmask 64512   ;;  %v68_v4 = vld [vmem:[#allocation5 + $0x60] sm:$0xff]  ;;  %v52_v5 = vld [vmem:[#allocation3] sm:$0xff]  ;;  %vm331_vm2 = vcmask 31744  }
  0x26   :  { %428 = vmatprep.subr.mxu1 %v574_v0  ;;  %460 = vmatprep.mubr.msk.f32.mxu1 %vm575_vm0, %v574_v0  ;;  %v163_v6 = vld [vmem:[#allocation5 + $0xf8] sm:$0xff]  ;;  %54 = vst.msk [vmem:[#allocation2] sm:$0xff] %vm53_vm1, %v52_v5  ;;  %v162_v8 = vld [vmem:[#allocation5 + $0xf0] sm:$0xff]  ;;  %v161_v9 = vld [vmem:[#allocation5 + $0xe8] sm:$0xff] }
  0x27   :  { %394 = vmatpush3.msra.mxu0 %v71_v1  ;;  %v67_v7 = vld [vmem:[#allocation5 + $0x58] sm:$0xff]  ;;  %429 = vmatpush3.msra.mxu1 %v163_v6  ;;  %v66_v10 = vld [vmem:[#allocation5 + $0x50] sm:$0xff]  ;;  %v160_v11 = vld [vmem:[#allocation5 + $0xe0] sm:$0xff] }
  0x28   :  { %395 = vmatprep.subr.mxu0 %v574_v0  ;;  %430 = vmatprep.subr.mxu1 %v574_v0  ;;  %v65_v12 = vld [vmem:[#allocation5 + $0x48] sm:$0xff]  ;;  %v159_v13 = vld [vmem:[#allocation5 + $0xd8] sm:$0xff]  ;;  %v64_v14 = vld [vmem:[#allocation5 + $0x40] sm:$0xff] }
  0x29   :  { %396 = vmatpush3.msra.mxu0 %v70_v2  ;;  %431 = vmatpush3.msra.mxu1 %v162_v8  ;;  %v158_v15 = vld [vmem:[#allocation5 + $0xd0] sm:$0xff]  ;;  %v63_v16 = vld [vmem:[#allocation5 + $0x38] sm:$0xff]  ;;  %v157_v17 = vld [vmem:[#allocation5 + $0xc8] sm:$0xff] }
  0x2a   :  { %397 = vmatprep.subr.mxu0 %v574_v0  ;;  %432 = vmatprep.subr.mxu1 %v574_v0  ;;  %v62_v18 = vld [vmem:[#allocation5 + $0x30] sm:$0xff]  ;;  %v156_v19 = vld [vmem:[#allocation5 + $0xc0] sm:$0xff]  ;;  %v61_v20 = vld [vmem:[#allocation5 + $0x28] sm:$0xff] }
  0x2b   :  { %398 = vmatpush3.msra.mxu0 %v69_v3  ;;  %433 = vmatpush3.msra.mxu1 %v161_v9  ;;  %v155_v21 = vld [vmem:[#allocation5 + $0xb8] sm:$0xff]  ;;  %v60_v22 = vld [vmem:[#allocation5 + $0x20] sm:$0xff]  ;;  %v154_v23 = vld [vmem:[#allocation5 + $0xb0] sm:$0xff] }
  0x2c   :  { %399 = vmatprep.subr.mxu0 %v574_v0  ;;  %434 = vmatprep.subr.mxu1 %v574_v0  ;;  %v59_v24 = vld [vmem:[#allocation5 + $0x18] sm:$0xff]  ;;  %v153_v25 = vld [vmem:[#allocation5 + $0xa8] sm:$0xff]  ;;  %v58_v26 = vld [vmem:[#allocation5 + $0x10] sm:$0xff] }
  0x2d   :  { %400 = vmatpush3.msra.mxu0 %v68_v4  ;;  %435 = vmatpush3.msra.mxu1 %v160_v11  ;;  %v152_v27 = vld [vmem:[#allocation5 + $0xa0] sm:$0xff]  ;;  %v57_v28 = vld [vmem:[#allocation5 + $0x8] sm:$0xff]  ;;  %v151_v29 = vld [vmem:[#allocation5 + $0x98] sm:$0xff] }
  0x2e   :  { %401 = vmatprep.subr.mxu0 %v574_v0  ;;  %436 = vmatprep.subr.mxu1 %v574_v0  ;;  %v56_v30 = vld [vmem:[#allocation5] sm:$0xff]  ;;  %v55_v31 = vld [vmem:[#allocation2] sm:$0xff]  ;;  %v149_v33 = vld [vmem:[#allocation5 + $0x88] sm:$0xff] }
  0x2f   :  { %402 = vmatpush3.msra.mxu0 %v67_v7  ;;  %437 = vmatpush3.msra.mxu1 %v159_v13  ;;  %v150_v32 = vld [vmem:[#allocation5 + $0x90] sm:$0xff]  ;;  %v148_v34 = vld [vmem:[#allocation5 + $0x80] sm:$0xff]  ;;  %v255_v35 = vld [vmem:[#allocation5 + $0x178] sm:$0xff] }
  0x30   :  { %403 = vmatprep.subr.mxu0 %v574_v0  ;;  %438 = vmatprep.subr.mxu1 %v574_v0  ;;  %v254_v36 = vld [vmem:[#allocation5 + $0x170] sm:$0xff]  ;;  %v253_v37 = vld [vmem:[#allocation5 + $0x168] sm:$0xff]  ;;  %v252_v38 = vld [vmem:[#allocation5 + $0x160] sm:$0xff] }
  0x31   :  { %404 = vmatpush3.msra.mxu0 %v66_v10  ;;  %439 = vmatpush3.msra.mxu1 %v158_v15  ;;  %v251_v39 = vld [vmem:[#allocation5 + $0x158] sm:$0xff]  ;;  %v250_v40 = vld [vmem:[#allocation5 + $0x150] sm:$0xff]  ;;  %v249_v41 = vld [vmem:[#allocation5 + $0x148] sm:$0xff] }
  0x32   :  { %405 = vmatprep.subr.mxu0 %v574_v0  ;;  %440 = vmatprep.subr.mxu1 %v574_v0  ;;  %v248_v42 = vld [vmem:[#allocation5 + $0x140] sm:$0xff]  ;;  %v247_v43 = vld [vmem:[#allocation5 + $0x138] sm:$0xff]  ;;  %v246_v44 = vld [vmem:[#allocation5 + $0x130] sm:$0xff] }
  0x33   :  { %406 = vmatpush3.msra.mxu0 %v65_v12  ;;  %441 = vmatpush3.msra.mxu1 %v157_v17  ;;  %v245_v45 = vld [vmem:[#allocation5 + $0x128] sm:$0xff]  ;;  %v244_v46 = vld [vmem:[#allocation5 + $0x120] sm:$0xff]  ;;  %v243_v47 = vld [vmem:[#allocation5 + $0x118] sm:$0xff] }
  0x34   :  { %407 = vmatprep.subr.mxu0 %v574_v0  ;;  %442 = vmatprep.subr.mxu1 %v574_v0  ;;  %v339_v48 = vld [vmem:[#allocation7] ss:$0 sm:$0xff]  ;;  %v242_v53 = vld [vmem:[#allocation5 + $0x110] sm:$0xff]  ;;  %v241_v54 = vld [vmem:[#allocation5 + $0x108] sm:$0xff] }
  0x35   :  { %408 = vmatpush3.msra.mxu0 %v64_v14  ;;  %443 = vmatpush3.msra.mxu1 %v156_v19  ;;  %v240_v55 = vld [vmem:[#allocation5 + $0x100] sm:$0xff] }
  0x36   :  { %409 = vmatprep.subr.mxu0 %v574_v0  ;;  %444 = vmatprep.subr.mxu1 %v574_v0  ;;  %v340_v56 = vld [vmem:[#allocation7 + $0x1] ss:$0 sm:$0xff]  ;;  %v341_v61 = vld [vmem:[#allocation7 + $0x2] ss:$0 sm:$0xff] }
  0x37   :  { %410 = vmatpush3.msra.mxu0 %v63_v16  ;;  %445 = vmatpush3.msra.mxu1 %v155_v21 }
  0x38   :  { %411 = vmatprep.subr.mxu0 %v574_v0  ;;  %446 = vmatprep.subr.mxu1 %v574_v0 }
  0x39   :  { %412 = vmatpush3.msra.mxu0 %v62_v18  ;;  %447 = vmatpush3.msra.mxu1 %v154_v23 }
  0x3a   :  { %413 = vmatprep.subr.mxu0 %v574_v0  ;;  %448 = vmatprep.subr.mxu1 %v574_v0 }
  0x3b   :  { %414 = vmatpush3.msra.mxu0 %v61_v20  ;;  %449 = vmatpush3.msra.mxu1 %v153_v25 }
  0x3c   :  { %415 = vmatprep.subr.mxu0 %v574_v0  ;;  %450 = vmatprep.subr.mxu1 %v574_v0 }
  0x3d   :  { %416 = vmatpush3.msra.mxu0 %v60_v22  ;;  %451 = vmatpush3.msra.mxu1 %v152_v27 }
  0x3e   :  { %417 = vmatprep.subr.mxu0 %v574_v0  ;;  %452 = vmatprep.subr.mxu1 %v574_v0 }
  0x3f   :  { %418 = vmatpush3.msra.mxu0 %v59_v24  ;;  %453 = vmatpush3.msra.mxu1 %v151_v29 }
  0x40   :  { %419 = vmatprep.subr.mxu0 %v574_v0  ;;  %454 = vmatprep.subr.mxu1 %v574_v0 }
  0x41   :  { %420 = vmatpush3.msra.mxu0 %v58_v26  ;;  %455 = vmatpush3.msra.mxu1 %v150_v32 }
  0x42   :  { %421 = vmatprep.subr.mxu0 %v574_v0  ;;  %456 = vmatprep.subr.mxu1 %v574_v0 }
  0x43   :  { %422 = vmatpush3.msra.mxu0 %v57_v28  ;;  %457 = vmatpush3.msra.mxu1 %v149_v33 }
  0x44   :  { %423 = vmatprep.subr.mxu0 %v574_v0  ;;  %458 = vmatprep.subr.mxu1 %v574_v0 }
  0x45   :  { %424 = vmatpush3.msra.mxu0 %v56_v30  ;;  %459 = vmatpush3.msra.mxu1 %v148_v34 }
  0x46   :  { %426 = vmatmul.mubr.f32.vlgmr.msra.gmra.mxu0 %v55_v31  ;;  %463 = vmatprep.subr.mxu0 %v574_v0 }
  0x47   :  { %495 = vmatprep.mubr.msk.f32.mxu0 %vm575_vm0, %v574_v0  ;;  %464 = vmatpush3.msra.mxu0 %v255_v35 }
  0x48   :  { %465 = vmatprep.subr.mxu0 %v574_v0 }
  0x49   :  { %466 = vmatpush3.msra.mxu0 %v254_v36 }
  0x4a   :  { %467 = vmatprep.subr.mxu0 %v574_v0 }
  0x4b   :  { %468 = vmatpush3.msra.mxu0 %v253_v37 }
  0x4c   :  { %469 = vmatprep.subr.mxu0 %v574_v0 }
  0x4d   :  { %470 = vmatpush3.msra.mxu0 %v252_v38 }
  0x4e   :  { %471 = vmatprep.subr.mxu0 %v574_v0 }
  0x4f   :  { %472 = vmatpush3.msra.mxu0 %v251_v39 }
  0x50   :  { %473 = vmatprep.subr.mxu0 %v574_v0 }
  0x51   :  { %474 = vmatpush3.msra.mxu0 %v250_v40 }
  0x52   :  { %475 = vmatprep.subr.mxu0 %v574_v0 }
  0x53   :  { %476 = vmatpush3.msra.mxu0 %v249_v41 }
  0x54   :  { %477 = vmatprep.subr.mxu0 %v574_v0 }
  0x55   :  { %478 = vmatpush3.msra.mxu0 %v248_v42 }
  0x56   :  { %479 = vmatprep.subr.mxu0 %v574_v0 }
  0x57   :  { %480 = vmatpush3.msra.mxu0 %v247_v43 }
  0x58   :  { %481 = vmatprep.subr.mxu0 %v574_v0 }
  0x59   :  { %482 = vmatpush3.msra.mxu0 %v246_v44 }
  0x5a   :  { %483 = vmatprep.subr.mxu0 %v574_v0 }
  0x5b   :  { %484 = vmatpush3.msra.mxu0 %v245_v45 }
  0x5c   :  { %485 = vmatprep.subr.mxu0 %v574_v0 }
  0x5d   :  { %486 = vmatpush3.msra.mxu0 %v244_v46 }
  0x5e   :  { %487 = vmatprep.subr.mxu0 %v574_v0 }
  0x5f   :  { %488 = vmatpush3.msra.mxu0 %v243_v47 }
  0x60   :  { %489 = vmatprep.subr.mxu0 %v574_v0 }
  0x61   :  { %490 = vmatpush3.msra.mxu0 %v242_v53 }
  0x62   :  { %491 = vmatprep.subr.mxu0 %v574_v0 }
  0x63   :  { %492 = vmatpush3.msra.mxu0 %v241_v54 }
  0x64   :  { %493 = vmatprep.subr.mxu0 %v574_v0 }
  0x65   :  { %494 = vmatpush3.msra.mxu0 %v240_v55 }
 0x106   :  { %v143_v49 = vpop.f32.mrf.mxu0 }
 0x107   :  { %v144_v50 = vadd.f32 %v339_v48, %v143_v49 }
 0x108   :  { %v427_v51 = vpop.f32.mrf.mxu0 }
 0x109   :  { %v147_v52 = vmax.f32 %v144_v50, 0.0 }
 0x10b   :  { %461 = vmatmul.mubr.f32.vlgmr.msra.gmra.mxu1 %v147_v52 }
 0x1cb   :  { %v235_v57 = vpop.f32.mrf.mxu1 }
 0x1cc   :  { %v236_v58 = vadd.f32 %v340_v56, %v235_v57 }
 0x1cd   :  { %v462_v59 = vpop.f32.mrf.mxu1 }
 0x1ce   :  { %v239_v60 = vmax.f32 %v236_v58, 0.0 }
 0x1d0   :  { %496 = vmatmul.mubr.f32.vlgmr.msra.gmra.mxu0 %v239_v60 }
 0x290   :  { %v327_v62 = vpop.f32.mrf.mxu0 }
 0x291   :  { %v328_v63 = vadd.f32 %v341_v61, %v327_v62 }
 0x292   :  { %v497_v1 = vpop.f32.mrf.mxu0 }
 0x293   :  { %332 = vst.msk [vmem:[%s666_s3] sm:$0xff] %vm331_vm2, %v328_v63 }
 0x294   :  { %337 = vsyncpa [#allocation4], 1 }
 0x295   :  { %338 = vsyncpa [#allocation6], 1 }

</bundles_post_ra>
